<compile_context>
chip_gen: v6e
topology: v6e:2x2x1
jax: 0.10.0
libtpu: 0.0.40
codegen_flags: <defaults>
</compile_context>

<pallas_src>
import functools

import jax
import jax.numpy as jnp
from jax.experimental import pallas as pl
from jax.experimental.pallas import tpu as pltpu

KERNEL_SIZE = 5
PAD = (KERNEL_SIZE - 1) // 2          # = 2 ('same' padding for the stride-1 branch)
BN_EPS = 1e-5
HALO = 128                            # lane-granular right-halo fetch (>= 2*PAD)
VMEM_LIMIT = 48 * 1024 * 1024         # fits v5e/v6e (128 MiB) and v7x (64 MiB physical)


def _round_up(v, m):
    return ((v + m - 1) // m) * m


# --------------------------------------------------------------------------------------
# Shared: k=5 conv of one time tile as 5 accumulated MXU matmuls.
# --------------------------------------------------------------------------------------
def _conv_tile(xm_ref, xh_ref, w_ref):
    """
    xm_ref: (1, Cin_p, TL)   bf16, x_p time columns [lt*TL, (lt+1)*TL)
    xh_ref: (1, Cin_p, HALO) bf16, x_p time columns [(lt+1)*TL, (lt+1)*TL + HALO)
    w_ref:  (K, Cout, Cin_p) bf16
    returns (Cout, TL) f32:  y[:, t] = sum_k W_k @ x_p[:, lt*TL + t + k]
    """
    xm = xm_ref[0]                                                   # (Cin_p, TL)
    xh = xh_ref[0]                                                   # (Cin_p, HALO)
    y = jnp.dot(w_ref[0], xm, preferred_element_type=jnp.float32)    # tap 0: aligned
    for k in range(1, KERNEL_SIZE):
        win = jnp.concatenate([xm[:, k:], xh[:, :k]], axis=1)        # (Cin_p, TL)
        y = y + jnp.dot(w_ref[k], win, preferred_element_type=jnp.float32)
    return y                                                         # (Cout, TL) f32


# --------------------------------------------------------------------------------------
# Phase 1: conv (recompute, not stored) -> per-tile per-channel [sum, sumsq]
# --------------------------------------------------------------------------------------
def _conv_stats_kernel(xm_ref, xh_ref, w_ref, stats_ref, *, l_valid, needs_mask):
    lt = pl.program_id(1)
    y = _conv_tile(xm_ref, xh_ref, w_ref)                            # (Cout, TL) f32
    tl = y.shape[1]

    def write_stats(yv):
        s = jnp.sum(yv, axis=1, keepdims=True)
        q = jnp.sum(yv * yv, axis=1, keepdims=True)
        stats_ref[0, 0] = jnp.concatenate([s, q], axis=1)            # (Cout, 2)

    if not needs_mask:
        write_stats(y)
    else:
        last = pl.num_programs(1) - 1

        @pl.when(lt != last)
        def _():
            write_stats(y)

        @pl.when(lt == last)
        def _():
            # Exclude padded tail columns (>= L) from the batch-norm statistics.
            col = jax.lax.broadcasted_iota(jnp.int32, y.shape, 1) + lt * tl
            write_stats(jnp.where(col < l_valid, y, 0.0))


# --------------------------------------------------------------------------------------
# Phase 2: conv recompute -> affine batch-norm -> Swish
# --------------------------------------------------------------------------------------
def _conv_bn_swish_kernel(xm_ref, xh_ref, w_ref, scale_ref, shift_ref, o_ref):
    y = _conv_tile(xm_ref, xh_ref, w_ref)                            # (Cout, TL) f32
    z = y * scale_ref[...] + shift_ref[...]                          # (Cout,1) broadcast
    o_ref[0] = z * jax.nn.sigmoid(z)


# --------------------------------------------------------------------------------------
# Wrapper
# --------------------------------------------------------------------------------------
def conv_module_forward(x, input_lengths, w, bias, gamma, beta):
    """ConvModule.forward for the stride=1 / groups=1 configuration (kernel_size=5)."""
    del bias  # cancelled exactly by train-mode BatchNorm mean subtraction

    B, Cin, L = x.shape
    Cout = w.shape[0]

    # Channel padding only to the bf16 sublane multiple; Cout stays unpadded.
    Cin_p = _round_up(Cin, 16)

    # Time tiling: TL is a multiple of 128 (1024 for long sequences).
    TL = min(1024, _round_up(L, 128))
    num_lt = pl.cdiv(L, TL)
    Lc = num_lt * TL                       # lane-dense padded output length
    L_in = Lc + HALO                       # input length incl. left pad + right halo
    halo_step = TL // HALO

    # Input layout: (B, Cin_p, L_in) bf16, real data at time columns [PAD, PAD+L).
    x_p = jnp.pad(
        x, ((0, 0), (0, Cin_p - Cin), (PAD, L_in - L - PAD))
    ).astype(jnp.bfloat16)

    # Weight layout: (K, Cout, Cin_p) bf16 for per-tap matmuls.
    w3d = jnp.pad(
        jnp.transpose(w, (2, 0, 1)), ((0, 0), (0, 0), (0, Cin_p - Cin))
    ).astype(jnp.bfloat16)

    grid = (B, num_lt)
    x_main_spec = pl.BlockSpec((1, Cin_p, TL), lambda b, lt: (b, 0, lt))
    x_halo_spec = pl.BlockSpec((1, Cin_p, HALO), lambda b, lt: (b, 0, (lt + 1) * halo_step))
    w_spec = pl.BlockSpec((KERNEL_SIZE, Cout, Cin_p), lambda b, lt: (0, 0, 0))

    # ---------------- Phase 1: per-tile conv stats (no stored intermediate) ----------------
    stats = pl.pallas_call(
        functools.partial(_conv_stats_kernel, l_valid=L, needs_mask=(Lc != L)),
        grid=grid,
        in_specs=[x_main_spec, x_halo_spec, w_spec],
        out_specs=pl.BlockSpec((1, 1, Cout, 2), lambda b, lt: (b, lt, 0, 0)),
        out_shape=jax.ShapeDtypeStruct((B, num_lt, Cout, 2), jnp.float32),
        compiler_params=pltpu.CompilerParams(
            dimension_semantics=("parallel", "parallel"),
            vmem_limit_bytes=VMEM_LIMIT,
        ),
    )(x_p, x_p, w3d)

    # ---------------- tiny glue: finish BN statistics ----------------
    n = float(B * L)
    ssum = jnp.sum(stats[..., 0], axis=(0, 1))                     # (Cout,)
    ssq = jnp.sum(stats[..., 1], axis=(0, 1))                      # (Cout,)
    mean = ssum / n
    var = jnp.maximum(ssq / n - mean * mean, 0.0)                  # clamp vs cancellation
    inv_std = jax.lax.rsqrt(var + BN_EPS)
    g = gamma.astype(jnp.float32)
    scale = (g * inv_std).reshape(Cout, 1)
    shift = (beta.astype(jnp.float32) - mean * g * inv_std).reshape(Cout, 1)

    # ---------------- Phase 2: conv recompute + normalize + Swish ----------------
    out_pad = pl.pallas_call(
        _conv_bn_swish_kernel,
        grid=grid,
        in_specs=[
            x_main_spec, x_halo_spec, w_spec,
            pl.BlockSpec((Cout, 1), lambda b, lt: (0, 0)),
            pl.BlockSpec((Cout, 1), lambda b, lt: (0, 0)),
        ],
        out_specs=pl.BlockSpec((1, Cout, TL), lambda b, lt: (b, 0, lt)),
        out_shape=jax.ShapeDtypeStruct((B, Cout, Lc), jnp.float32),
        compiler_params=pltpu.CompilerParams(
            dimension_semantics=("parallel", "parallel"),
            vmem_limit_bytes=VMEM_LIMIT,
        ),
    )(x_p, x_p, w3d, scale, shift)

    out = out_pad if Lc == L else out_pad[:, :, :L]

    # _get_sequence_lengths: (len + 2*pad - dilation*(k-1) - 1) // stride + 1
    out_lengths = (input_lengths + 2 * PAD - 1 * (KERNEL_SIZE - 1) - 1) // 1 + 1
    return out, out_lengths


# --------------------------------------------------------------------------------------
# Pure-JAX reference (PyTorch Conv1d + train-mode BatchNorm1d + Swish).
# Conv operands are rounded to bf16 to mirror the kernel's MXU inputs.
# --------------------------------------------------------------------------------------
def _reference_forward(x, input_lengths, w, bias, gamma, beta):
    xb = x.astype(jnp.bfloat16).astype(jnp.float32)
    wb = w.astype(jnp.bfloat16).astype(jnp.float32)
    y = jax.lax.conv_general_dilated(
        xb, wb, window_strides=(1,), padding=[(PAD, PAD)],
        dimension_numbers=("NCH", "OIH", "NCH"),
    ) + bias[None, :, None]
    mean = jnp.mean(y, axis=(0, 2), keepdims=True)
    var = jnp.mean((y - mean) ** 2, axis=(0, 2), keepdims=True)
    y = (y - mean) / jnp.sqrt(var + BN_EPS)
    y = y * gamma[None, :, None] + beta[None, :, None]
    y = y * jax.nn.sigmoid(y)
    out_lengths = (input_lengths + 2 * PAD - (KERNEL_SIZE - 1) - 1) // 1 + 1
    return y, out_lengths


if __name__ == "__main__":
    # Small shapes consistent with ContextNet's (batch, dimension, seq_length) inputs.
    B, C_IN, C_OUT, L = 2, 8, 8, 16

    key = jax.random.PRNGKey(0)
    k1, k2, k3, k4, k5 = jax.random.split(key, 5)

    x = jax.random.normal(k1, (B, C_IN, L), dtype=jnp.float32)
    input_lengths = jnp.array([L, L - 3], dtype=jnp.int32)

    w = jax.random.normal(k2, (C_OUT, C_IN, KERNEL_SIZE), dtype=jnp.float32) * 0.1
    bias = jax.random.normal(k3, (C_OUT,), dtype=jnp.float32) * 0.1
    gamma = 1.0 + 0.05 * jax.random.normal(k4, (C_OUT,), dtype=jnp.float32)
    beta = 0.05 * jax.random.normal(k5, (C_OUT,), dtype=jnp.float32)

    fwd = jax.jit(conv_module_forward)
    out, out_lens = fwd(x, input_lengths, w, bias, gamma, beta)
    jax.block_until_ready(out)
    jax.block_until_ready(out_lens)

    ref_out, ref_lens = _reference_forward(x, input_lengths, w, bias, gamma, beta)
    assert out.shape == (B, C_OUT, L)
    assert jnp.allclose(out, ref_out, rtol=1e-3, atol=1e-3), "mismatch vs reference"
    assert jnp.array_equal(out_lens, ref_lens), "length mismatch vs reference"

    print("KERNEL_OK")
</pallas_src>

<mosaic_0001>
module attributes {stable_mosaic.version = 11 : i64} {
  func.func @_conv_stats_kernel(%arg0: i32, %arg1: i32, %arg2: memref<1x16x128xbf16, #tpu.memory_space<vmem>>, %arg3: memref<1x16x128xbf16, #tpu.memory_space<vmem>>, %arg4: memref<5x8x16xbf16, #tpu.memory_space<vmem>>, %arg5: memref<1x1x8x2xf32, #tpu.memory_space<vmem>>) attributes {dimension_semantics = [#tpu.dimension_semantics<parallel>, #tpu.dimension_semantics<parallel>], iteration_bounds = array<i64: 2, 1>, scalar_prefetch = 0 : i64, scratch_operands = 0 : i64, tpu.core_type = #tpu.core_type<tc>, window_params = [{transform_indices = @transform_0, window_bounds = array<i64: 1, 16, 128>}, {transform_indices = @transform_1, window_bounds = array<i64: 1, 16, 128>}, {pipeline_mode = #tpu.pipeline_mode<synchronous>, transform_indices = @transform_2, window_bounds = array<i64: 5, 8, 16>}, {transform_indices = @transform_3, window_bounds = array<i64: 1, 1, 8, 2>}]} {
    %c0 = arith.constant 0 : index
    %c0_0 = arith.constant 0 : index
    %c0_1 = arith.constant 0 : index
    %0 = vector.load %arg2[%c0, %c0_0, %c0_1] : memref<1x16x128xbf16, #tpu.memory_space<vmem>>, vector<1x16x128xbf16>
    %1 = vector.shape_cast %0 : vector<1x16x128xbf16> to vector<16x128xbf16>
    %c0_2 = arith.constant 0 : index
    %c0_3 = arith.constant 0 : index
    %c0_4 = arith.constant 0 : index
    %2 = vector.load %arg3[%c0_2, %c0_3, %c0_4] : memref<1x16x128xbf16, #tpu.memory_space<vmem>>, vector<1x16x128xbf16>
    %3 = vector.shape_cast %2 : vector<1x16x128xbf16> to vector<16x128xbf16>
    %c0_5 = arith.constant 0 : index
    %c0_6 = arith.constant 0 : index
    %c0_7 = arith.constant 0 : index
    %4 = vector.load %arg4[%c0_5, %c0_6, %c0_7] : memref<5x8x16xbf16, #tpu.memory_space<vmem>>, vector<1x8x16xbf16>
    %5 = vector.shape_cast %4 : vector<1x8x16xbf16> to vector<8x16xbf16>
    %cst = arith.constant dense<0.000000e+00> : vector<8x128xf32>
    %6 = tpu.matmul %5, %1, %cst {dimension_numbers = #tpu.dot_dimension_numbers<[1], [0], [0], [1], [0, 0, 1, 1], [], []>} : vector<8x16xbf16>, vector<16x128xbf16>, vector<8x128xf32> -> vector<8x128xf32>
    %7 = vector.extract_strided_slice %1 {offsets = [0, 1], sizes = [16, 127], strides = [1, 1]} : vector<16x128xbf16> to vector<16x127xbf16>
    %8 = vector.extract_strided_slice %3 {offsets = [0, 0], sizes = [16, 1], strides = [1, 1]} : vector<16x128xbf16> to vector<16x1xbf16>
    %9 = tpu.concatenate %7, %8 in 1 : vector<16x127xbf16>, vector<16x1xbf16> -> vector<16x128xbf16>
    %c1 = arith.constant 1 : index
    %c0_8 = arith.constant 0 : index
    %c0_9 = arith.constant 0 : index
    %10 = vector.load %arg4[%c1, %c0_8, %c0_9] : memref<5x8x16xbf16, #tpu.memory_space<vmem>>, vector<1x8x16xbf16>
    %11 = vector.shape_cast %10 : vector<1x8x16xbf16> to vector<8x16xbf16>
    %cst_10 = arith.constant dense<0.000000e+00> : vector<8x128xf32>
    %12 = tpu.matmul %11, %9, %cst_10 {dimension_numbers = #tpu.dot_dimension_numbers<[1], [0], [0], [1], [0, 0, 1, 1], [], []>} : vector<8x16xbf16>, vector<16x128xbf16>, vector<8x128xf32> -> vector<8x128xf32>
    %13 = arith.addf %6, %12 : vector<8x128xf32>
    %14 = vector.extract_strided_slice %1 {offsets = [0, 2], sizes = [16, 126], strides = [1, 1]} : vector<16x128xbf16> to vector<16x126xbf16>
    %15 = vector.extract_strided_slice %3 {offsets = [0, 0], sizes = [16, 2], strides = [1, 1]} : vector<16x128xbf16> to vector<16x2xbf16>
    %16 = tpu.concatenate %14, %15 in 1 : vector<16x126xbf16>, vector<16x2xbf16> -> vector<16x128xbf16>
    %c2 = arith.constant 2 : index
    %c0_11 = arith.constant 0 : index
    %c0_12 = arith.constant 0 : index
    %17 = vector.load %arg4[%c2, %c0_11, %c0_12] : memref<5x8x16xbf16, #tpu.memory_space<vmem>>, vector<1x8x16xbf16>
    %18 = vector.shape_cast %17 : vector<1x8x16xbf16> to vector<8x16xbf16>
    %cst_13 = arith.constant dense<0.000000e+00> : vector<8x128xf32>
    %19 = tpu.matmul %18, %16, %cst_13 {dimension_numbers = #tpu.dot_dimension_numbers<[1], [0], [0], [1], [0, 0, 1, 1], [], []>} : vector<8x16xbf16>, vector<16x128xbf16>, vector<8x128xf32> -> vector<8x128xf32>
    %20 = arith.addf %13, %19 : vector<8x128xf32>
    %21 = vector.extract_strided_slice %1 {offsets = [0, 3], sizes = [16, 125], strides = [1, 1]} : vector<16x128xbf16> to vector<16x125xbf16>
    %22 = vector.extract_strided_slice %3 {offsets = [0, 0], sizes = [16, 3], strides = [1, 1]} : vector<16x128xbf16> to vector<16x3xbf16>
    %23 = tpu.concatenate %21, %22 in 1 : vector<16x125xbf16>, vector<16x3xbf16> -> vector<16x128xbf16>
    %c3 = arith.constant 3 : index
    %c0_14 = arith.constant 0 : index
    %c0_15 = arith.constant 0 : index
    %24 = vector.load %arg4[%c3, %c0_14, %c0_15] : memref<5x8x16xbf16, #tpu.memory_space<vmem>>, vector<1x8x16xbf16>
    %25 = vector.shape_cast %24 : vector<1x8x16xbf16> to vector<8x16xbf16>
    %cst_16 = arith.constant dense<0.000000e+00> : vector<8x128xf32>
    %26 = tpu.matmul %25, %23, %cst_16 {dimension_numbers = #tpu.dot_dimension_numbers<[1], [0], [0], [1], [0, 0, 1, 1], [], []>} : vector<8x16xbf16>, vector<16x128xbf16>, vector<8x128xf32> -> vector<8x128xf32>
    %27 = arith.addf %20, %26 : vector<8x128xf32>
    %28 = vector.extract_strided_slice %1 {offsets = [0, 4], sizes = [16, 124], strides = [1, 1]} : vector<16x128xbf16> to vector<16x124xbf16>
    %29 = vector.extract_strided_slice %3 {offsets = [0, 0], sizes = [16, 4], strides = [1, 1]} : vector<16x128xbf16> to vector<16x4xbf16>
    %30 = tpu.concatenate %28, %29 in 1 : vector<16x124xbf16>, vector<16x4xbf16> -> vector<16x128xbf16>
    %c4 = arith.constant 4 : index
    %c0_17 = arith.constant 0 : index
    %c0_18 = arith.constant 0 : index
    %31 = vector.load %arg4[%c4, %c0_17, %c0_18] : memref<5x8x16xbf16, #tpu.memory_space<vmem>>, vector<1x8x16xbf16>
    %32 = vector.shape_cast %31 : vector<1x8x16xbf16> to vector<8x16xbf16>
    %cst_19 = arith.constant dense<0.000000e+00> : vector<8x128xf32>
    %33 = tpu.matmul %32, %30, %cst_19 {dimension_numbers = #tpu.dot_dimension_numbers<[1], [0], [0], [1], [0, 0, 1, 1], [], []>} : vector<8x16xbf16>, vector<16x128xbf16>, vector<8x128xf32> -> vector<8x128xf32>
    %34 = arith.addf %27, %33 : vector<8x128xf32>
    %c0_i32 = arith.constant 0 : i32
    %35 = arith.cmpi ne, %arg1, %c0_i32 : i32
    %36 = arith.extui %35 : i1 to i32
    %c0_i32_20 = arith.constant 0 : i32
    %37 = arith.cmpi ne, %36, %c0_i32_20 : i32
    scf.if %37 {
      %cst_23 = arith.constant dense<0.000000e+00> : vector<8xf32>
      %41 = vector.multi_reduction <add>, %34, %cst_23 [1] : vector<8x128xf32> to vector<8xf32>
      %42 = vector.shape_cast %41 : vector<8xf32> to vector<8x1xf32>
      %43 = arith.mulf %34, %34 : vector<8x128xf32>
      %cst_24 = arith.constant dense<0.000000e+00> : vector<8xf32>
      %44 = vector.multi_reduction <add>, %43, %cst_24 [1] : vector<8x128xf32> to vector<8xf32>
      %45 = vector.shape_cast %44 : vector<8xf32> to vector<8x1xf32>
      %46 = tpu.concatenate %42, %45 in 1 : vector<8x1xf32>, vector<8x1xf32> -> vector<8x2xf32>
      %c0_25 = arith.constant 0 : index
      %c0_26 = arith.constant 0 : index
      %c0_27 = arith.constant 0 : index
      %c0_28 = arith.constant 0 : index
      %47 = vector.load %arg5[%c0_25, %c0_26, %c0_27, %c0_28] : memref<1x1x8x2xf32, #tpu.memory_space<vmem>>, vector<1x1x8x2xf32>
      %48 = vector.shape_cast %47 : vector<1x1x8x2xf32> to vector<8x2xf32>
      %49 = vector.shape_cast %46 : vector<8x2xf32> to vector<1x1x8x2xf32>
      tpu.vector_store %arg5[%c0_25, %c0_26, %c0_27, %c0_28], %49 {strides = array<i32>} : memref<1x1x8x2xf32, #tpu.memory_space<vmem>>, vector<1x1x8x2xf32>,
    } else {
    }
    %c0_i32_21 = arith.constant 0 : i32
    %38 = arith.cmpi eq, %arg1, %c0_i32_21 : i32
    %39 = arith.extui %38 : i1 to i32
    %c0_i32_22 = arith.constant 0 : i32
    %40 = arith.cmpi ne, %39, %c0_i32_22 : i32
    scf.if %40 {
      %41 = tpu.iota {dimensions = array<i32: 1>} : vector<8x128xi32>
      %c128_i32 = arith.constant 128 : i32
      %42 = arith.muli %arg1, %c128_i32 : i32
      %43 = vector.broadcast %42 : i32 to vector<8x128xi32>
      %44 = arith.addi %41, %43 : vector<8x128xi32>
      %c16_i32 = arith.constant 16 : i32
      %45 = vector.broadcast %c16_i32 : i32 to vector<8x128xi32>
      %46 = arith.cmpi slt, %44, %45 : vector<8x128xi32>
      %cst_23 = arith.constant 0.000000e+00 : f32
      %47 = vector.broadcast %cst_23 : f32 to vector<8x128xf32>
      %48 = arith.select %46, %34, %47 : vector<8x128xi1>, vector<8x128xf32>
      %cst_24 = arith.constant dense<0.000000e+00> : vector<8xf32>
      %49 = vector.multi_reduction <add>, %48, %cst_24 [1] : vector<8x128xf32> to vector<8xf32>
      %50 = vector.shape_cast %49 : vector<8xf32> to vector<8x1xf32>
      %51 = arith.mulf %48, %48 : vector<8x128xf32>
      %cst_25 = arith.constant dense<0.000000e+00> : vector<8xf32>
      %52 = vector.multi_reduction <add>, %51, %cst_25 [1] : vector<8x128xf32> to vector<8xf32>
      %53 = vector.shape_cast %52 : vector<8xf32> to vector<8x1xf32>
      %54 = tpu.concatenate %50, %53 in 1 : vector<8x1xf32>, vector<8x1xf32> -> vector<8x2xf32>
      %c0_26 = arith.constant 0 : index
      %c0_27 = arith.constant 0 : index
      %c0_28 = arith.constant 0 : index
      %c0_29 = arith.constant 0 : index
      %55 = vector.load %arg5[%c0_26, %c0_27, %c0_28, %c0_29] : memref<1x1x8x2xf32, #tpu.memory_space<vmem>>, vector<1x1x8x2xf32>
      %56 = vector.shape_cast %55 : vector<1x1x8x2xf32> to vector<8x2xf32>
      %57 = vector.shape_cast %54 : vector<8x2xf32> to vector<1x1x8x2xf32>
      tpu.vector_store %arg5[%c0_26, %c0_27, %c0_28, %c0_29], %57 {strides = array<i32>} : memref<1x1x8x2xf32, #tpu.memory_space<vmem>>, vector<1x1x8x2xf32>,
    } else {
    }
    return
  }
  func.func @transform_0(%arg0: i32, %arg1: i32) -> (i32, i32, i32) {
    %c0_i32 = arith.constant 0 : i32
    %c0_i32_0 = arith.constant 0 : i32
    return %arg0, %c0_i32, %arg1 : i32, i32, i32
  }
  func.func @transform_1(%arg0: i32, %arg1: i32) -> (i32, i32, i32) {
    %c1_i32 = arith.constant 1 : i32
    %0 = arith.addi %arg1, %c1_i32 : i32
    %c1_i32_0 = arith.constant 1 : i32
    %1 = arith.muli %0, %c1_i32_0 : i32
    %c0_i32 = arith.constant 0 : i32
    %c0_i32_1 = arith.constant 0 : i32
    return %arg0, %c0_i32, %1 : i32, i32, i32
  }
  func.func @transform_2(%arg0: i32, %arg1: i32) -> (i32, i32, i32) {
    %c0_i32 = arith.constant 0 : i32
    %c0_i32_0 = arith.constant 0 : i32
    %c0_i32_1 = arith.constant 0 : i32
    %c0_i32_2 = arith.constant 0 : i32
    return %c0_i32, %c0_i32_0, %c0_i32_1 : i32, i32, i32
  }
  func.func @transform_3(%arg0: i32, %arg1: i32) -> (i32, i32, i32, i32) {
    %c0_i32 = arith.constant 0 : i32
    %c0_i32_0 = arith.constant 0 : i32
    %c0_i32_1 = arith.constant 0 : i32
    return %arg0, %arg1, %c0_i32, %c0_i32_0 : i32, i32, i32, i32
  }
}

module attributes {stable_mosaic.version = 11 : i64} {
  func.func @_conv_bn_swish_kernel(%arg0: i32, %arg1: i32, %arg2: memref<1x16x128xbf16, #tpu.memory_space<vmem>>, %arg3: memref<1x16x128xbf16, #tpu.memory_space<vmem>>, %arg4: memref<5x8x16xbf16, #tpu.memory_space<vmem>>, %arg5: memref<8x1xf32, #tpu.memory_space<vmem>>, %arg6: memref<8x1xf32, #tpu.memory_space<vmem>>, %arg7: memref<1x8x128xf32, #tpu.memory_space<vmem>>) attributes {dimension_semantics = [#tpu.dimension_semantics<parallel>, #tpu.dimension_semantics<parallel>], iteration_bounds = array<i64: 2, 1>, scalar_prefetch = 0 : i64, scratch_operands = 0 : i64, tpu.core_type = #tpu.core_type<tc>, window_params = [{transform_indices = @transform_0, window_bounds = array<i64: 1, 16, 128>}, {transform_indices = @transform_1, window_bounds = array<i64: 1, 16, 128>}, {pipeline_mode = #tpu.pipeline_mode<synchronous>, transform_indices = @transform_2, window_bounds = array<i64: 5, 8, 16>}, {pipeline_mode = #tpu.pipeline_mode<synchronous>, transform_indices = @transform_3, window_bounds = array<i64: 8, 1>}, {pipeline_mode = #tpu.pipeline_mode<synchronous>, transform_indices = @transform_4, window_bounds = array<i64: 8, 1>}, {transform_indices = @transform_5, window_bounds = array<i64: 1, 8, 128>}]} {
    %c0 = arith.constant 0 : index
    %c0_0 = arith.constant 0 : index
    %c0_1 = arith.constant 0 : index
    %0 = vector.load %arg2[%c0, %c0_0, %c0_1] : memref<1x16x128xbf16, #tpu.memory_space<vmem>>, vector<1x16x128xbf16>
    %1 = vector.shape_cast %0 : vector<1x16x128xbf16> to vector<16x128xbf16>
    %c0_2 = arith.constant 0 : index
    %c0_3 = arith.constant 0 : index
    %c0_4 = arith.constant 0 : index
    %2 = vector.load %arg3[%c0_2, %c0_3, %c0_4] : memref<1x16x128xbf16, #tpu.memory_space<vmem>>, vector<1x16x128xbf16>
    %3 = vector.shape_cast %2 : vector<1x16x128xbf16> to vector<16x128xbf16>
    %c0_5 = arith.constant 0 : index
    %c0_6 = arith.constant 0 : index
    %c0_7 = arith.constant 0 : index
    %4 = vector.load %arg4[%c0_5, %c0_6, %c0_7] : memref<5x8x16xbf16, #tpu.memory_space<vmem>>, vector<1x8x16xbf16>
    %5 = vector.shape_cast %4 : vector<1x8x16xbf16> to vector<8x16xbf16>
    %cst = arith.constant dense<0.000000e+00> : vector<8x128xf32>
    %6 = tpu.matmul %5, %1, %cst {dimension_numbers = #tpu.dot_dimension_numbers<[1], [0], [0], [1], [0, 0, 1, 1], [], []>} : vector<8x16xbf16>, vector<16x128xbf16>, vector<8x128xf32> -> vector<8x128xf32>
    %7 = vector.extract_strided_slice %1 {offsets = [0, 1], sizes = [16, 127], strides = [1, 1]} : vector<16x128xbf16> to vector<16x127xbf16>
    %8 = vector.extract_strided_slice %3 {offsets = [0, 0], sizes = [16, 1], strides = [1, 1]} : vector<16x128xbf16> to vector<16x1xbf16>
    %9 = tpu.concatenate %7, %8 in 1 : vector<16x127xbf16>, vector<16x1xbf16> -> vector<16x128xbf16>
    %c1 = arith.constant 1 : index
    %c0_8 = arith.constant 0 : index
    %c0_9 = arith.constant 0 : index
    %10 = vector.load %arg4[%c1, %c0_8, %c0_9] : memref<5x8x16xbf16, #tpu.memory_space<vmem>>, vector<1x8x16xbf16>
    %11 = vector.shape_cast %10 : vector<1x8x16xbf16> to vector<8x16xbf16>
    %cst_10 = arith.constant dense<0.000000e+00> : vector<8x128xf32>
    %12 = tpu.matmul %11, %9, %cst_10 {dimension_numbers = #tpu.dot_dimension_numbers<[1], [0], [0], [1], [0, 0, 1, 1], [], []>} : vector<8x16xbf16>, vector<16x128xbf16>, vector<8x128xf32> -> vector<8x128xf32>
    %13 = arith.addf %6, %12 : vector<8x128xf32>
    %14 = vector.extract_strided_slice %1 {offsets = [0, 2], sizes = [16, 126], strides = [1, 1]} : vector<16x128xbf16> to vector<16x126xbf16>
    %15 = vector.extract_strided_slice %3 {offsets = [0, 0], sizes = [16, 2], strides = [1, 1]} : vector<16x128xbf16> to vector<16x2xbf16>
    %16 = tpu.concatenate %14, %15 in 1 : vector<16x126xbf16>, vector<16x2xbf16> -> vector<16x128xbf16>
    %c2 = arith.constant 2 : index
    %c0_11 = arith.constant 0 : index
    %c0_12 = arith.constant 0 : index
    %17 = vector.load %arg4[%c2, %c0_11, %c0_12] : memref<5x8x16xbf16, #tpu.memory_space<vmem>>, vector<1x8x16xbf16>
    %18 = vector.shape_cast %17 : vector<1x8x16xbf16> to vector<8x16xbf16>
    %cst_13 = arith.constant dense<0.000000e+00> : vector<8x128xf32>
    %19 = tpu.matmul %18, %16, %cst_13 {dimension_numbers = #tpu.dot_dimension_numbers<[1], [0], [0], [1], [0, 0, 1, 1], [], []>} : vector<8x16xbf16>, vector<16x128xbf16>, vector<8x128xf32> -> vector<8x128xf32>
    %20 = arith.addf %13, %19 : vector<8x128xf32>
    %21 = vector.extract_strided_slice %1 {offsets = [0, 3], sizes = [16, 125], strides = [1, 1]} : vector<16x128xbf16> to vector<16x125xbf16>
    %22 = vector.extract_strided_slice %3 {offsets = [0, 0], sizes = [16, 3], strides = [1, 1]} : vector<16x128xbf16> to vector<16x3xbf16>
    %23 = tpu.concatenate %21, %22 in 1 : vector<16x125xbf16>, vector<16x3xbf16> -> vector<16x128xbf16>
    %c3 = arith.constant 3 : index
    %c0_14 = arith.constant 0 : index
    %c0_15 = arith.constant 0 : index
    %24 = vector.load %arg4[%c3, %c0_14, %c0_15] : memref<5x8x16xbf16, #tpu.memory_space<vmem>>, vector<1x8x16xbf16>
    %25 = vector.shape_cast %24 : vector<1x8x16xbf16> to vector<8x16xbf16>
    %cst_16 = arith.constant dense<0.000000e+00> : vector<8x128xf32>
    %26 = tpu.matmul %25, %23, %cst_16 {dimension_numbers = #tpu.dot_dimension_numbers<[1], [0], [0], [1], [0, 0, 1, 1], [], []>} : vector<8x16xbf16>, vector<16x128xbf16>, vector<8x128xf32> -> vector<8x128xf32>
    %27 = arith.addf %20, %26 : vector<8x128xf32>
    %28 = vector.extract_strided_slice %1 {offsets = [0, 4], sizes = [16, 124], strides = [1, 1]} : vector<16x128xbf16> to vector<16x124xbf16>
    %29 = vector.extract_strided_slice %3 {offsets = [0, 0], sizes = [16, 4], strides = [1, 1]} : vector<16x128xbf16> to vector<16x4xbf16>
    %30 = tpu.concatenate %28, %29 in 1 : vector<16x124xbf16>, vector<16x4xbf16> -> vector<16x128xbf16>
    %c4 = arith.constant 4 : index
    %c0_17 = arith.constant 0 : index
    %c0_18 = arith.constant 0 : index
    %31 = vector.load %arg4[%c4, %c0_17, %c0_18] : memref<5x8x16xbf16, #tpu.memory_space<vmem>>, vector<1x8x16xbf16>
    %32 = vector.shape_cast %31 : vector<1x8x16xbf16> to vector<8x16xbf16>
    %cst_19 = arith.constant dense<0.000000e+00> : vector<8x128xf32>
    %33 = tpu.matmul %32, %30, %cst_19 {dimension_numbers = #tpu.dot_dimension_numbers<[1], [0], [0], [1], [0, 0, 1, 1], [], []>} : vector<8x16xbf16>, vector<16x128xbf16>, vector<8x128xf32> -> vector<8x128xf32>
    %34 = arith.addf %27, %33 : vector<8x128xf32>
    %c0_20 = arith.constant 0 : index
    %c0_21 = arith.constant 0 : index
    %35 = vector.load %arg5[%c0_20, %c0_21] : memref<8x1xf32, #tpu.memory_space<vmem>>, vector<8x1xf32>
    %36 = vector.broadcast %35 : vector<8x1xf32> to vector<8x128xf32>
    %37 = arith.mulf %34, %36 : vector<8x128xf32>
    %c0_22 = arith.constant 0 : index
    %c0_23 = arith.constant 0 : index
    %38 = vector.load %arg6[%c0_22, %c0_23] : memref<8x1xf32, #tpu.memory_space<vmem>>, vector<8x1xf32>
    %39 = vector.broadcast %38 : vector<8x1xf32> to vector<8x128xf32>
    %40 = arith.addf %37, %39 : vector<8x128xf32>
    %41 = arith.negf %40 : vector<8x128xf32>
    %42 = math.exp %41 : vector<8x128xf32>
    %cst_24 = arith.constant 1.000000e+00 : f32
    %43 = vector.broadcast %cst_24 : f32 to vector<8x128xf32>
    %44 = arith.addf %43, %42 : vector<8x128xf32>
    %45 = arith.divf %43, %44 : vector<8x128xf32>
    %46 = arith.mulf %40, %45 : vector<8x128xf32>
    %c0_25 = arith.constant 0 : index
    %c0_26 = arith.constant 0 : index
    %c0_27 = arith.constant 0 : index
    %47 = vector.load %arg7[%c0_25, %c0_26, %c0_27] : memref<1x8x128xf32, #tpu.memory_space<vmem>>, vector<1x8x128xf32>
    %48 = vector.shape_cast %47 : vector<1x8x128xf32> to vector<8x128xf32>
    %49 = vector.shape_cast %46 : vector<8x128xf32> to vector<1x8x128xf32>
    tpu.vector_store %arg7[%c0_25, %c0_26, %c0_27], %49 {strides = array<i32>} : memref<1x8x128xf32, #tpu.memory_space<vmem>>, vector<1x8x128xf32>,
    return
  }
  func.func @transform_0(%arg0: i32, %arg1: i32) -> (i32, i32, i32) {
    %c0_i32 = arith.constant 0 : i32
    %c0_i32_0 = arith.constant 0 : i32
    return %arg0, %c0_i32, %arg1 : i32, i32, i32
  }
  func.func @transform_1(%arg0: i32, %arg1: i32) -> (i32, i32, i32) {
    %c1_i32 = arith.constant 1 : i32
    %0 = arith.addi %arg1, %c1_i32 : i32
    %c1_i32_0 = arith.constant 1 : i32
    %1 = arith.muli %0, %c1_i32_0 : i32
    %c0_i32 = arith.constant 0 : i32
    %c0_i32_1 = arith.constant 0 : i32
    return %arg0, %c0_i32, %1 : i32, i32, i32
  }
  func.func @transform_2(%arg0: i32, %arg1: i32) -> (i32, i32, i32) {
    %c0_i32 = arith.constant 0 : i32
    %c0_i32_0 = arith.constant 0 : i32
    %c0_i32_1 = arith.constant 0 : i32
    %c0_i32_2 = arith.constant 0 : i32
    return %c0_i32, %c0_i32_0, %c0_i32_1 : i32, i32, i32
  }
  func.func @transform_3(%arg0: i32, %arg1: i32) -> (i32, i32) {
    %c0_i32 = arith.constant 0 : i32
    %c0_i32_0 = arith.constant 0 : i32
    %c0_i32_1 = arith.constant 0 : i32
    return %c0_i32, %c0_i32_0 : i32, i32
  }
  func.func @transform_4(%arg0: i32, %arg1: i32) -> (i32, i32) {
    %c0_i32 = arith.constant 0 : i32
    %c0_i32_0 = arith.constant 0 : i32
    %c0_i32_1 = arith.constant 0 : i32
    return %c0_i32, %c0_i32_0 : i32, i32
  }
  func.func @transform_5(%arg0: i32, %arg1: i32) -> (i32, i32, i32) {
    %c0_i32 = arith.constant 0 : i32
    %c0_i32_0 = arith.constant 0 : i32
    return %arg0, %c0_i32, %arg1 : i32, i32, i32
  }
}

</mosaic_0001>

<bundles_post_ra>
// kernel: conv_module_forward.2
= control target key start
LH: loop header
LB: loop body
LE: loop exit
PB: predicated region body
PF: predicated region fallthrough
CT: control target
= control target key end

     0   :  { %s913_s12 = smov 0   ;;  %s915_s13 = smov 0   ;;  %s1017_s0 = inlined_call_operand.vmem [shape: bf16[2,16,256], index: 0, kind: input, shape index: {}, may-alias: {0,1}]   ;;  %s1018_s1 = inlined_call_operand.vmem [shape: bf16[2,16,256], index: 1, kind: input, shape index: {}, may-alias: {0,1}]   ;;  %s1019_s2 = inlined_call_operand.vmem [shape: bf16[5,8,16], index: 2, kind: input, shape index: {}]   ;;  %s1020_s3 = inlined_call_operand.vmem [shape: f32[2,1,8,2], index: 3, kind: output, shape index: {}]  }
   0x1   :  { %s917_s14 = smov 0   ;;  %s919_s15 = smov 0  }
   0x2   :  { %s921_s16 = smov 0  }
   0x3 LB: > { %s25_s17 = sadd.s32 1, %s881_s15  ;;  %p41_p1 = scmp.ne.s32.totalorder %s873_s13, %s869_s12  ;;  %s885_s16 = sphi %s921_s16, %s13_s16   ;;  %s881_s15 = sphi %s919_s15, %s1025_s15   ;;  %s877_s14 = sphi %s917_s14, %s1024_s14   ;;  %s873_s13 = sphi %s915_s13, %s1023_s13   ;;  %s869_s12 = sphi %s913_s12, %s1022_s12  }
   0x4   : > { %p27_p0 = scmp.ge.s32.totalorder %s25_s17, 2  ;;  %p42_p2 = scmp.eq.s32.totalorder %s885_s16, 0 }
   0x5   : > { %s34_s20 = sadd.s32 1, %s873_s13  ;;  %p731_p5 = scmp.ge.s32.totalorder %s885_s16, 2 }
   0x6   : > { %s1027_s17 = smov (%p27_p0, %s25_s17), 0  ;;  %p944_p3 = por %p42_p2, %p41_p1 }
   0x7   : > { %s29_s19 = ssub.s32 %s881_s15, %s1027_s17  ;;  %149 = sbr.rel (%p731_p5) target bundleno = 22 (0x16), region = 20 }
   0x8   : > { %p32_p4 = scmp.eq.s32.totalorder %s29_s19, 0 }
   0xa   : > { %s952_s21 = scalar_select %p32_p4, %s873_s13, %s34_s20  }
   0xc   : > { %152 = sbr.rel (!%p944_p3) target bundleno = 17 (0x11), region = 24  ;;  %s154_s22 = sand.u32 (%p944_p3), 1, %s873_s13  }
   0xd   : > { %s757_s23 = sshll.u32 (%p944_p3), %s881_s15, 4  ;;  %s732_s24 = sshll.u32 (%p944_p3), %s154_s22, 3 }
   0xe   : > { %s160_s27 = scalar_lea.vmem (%p944_p3), %s1017_s0, %s757_s23  ;;  %s156_s28 = scalar_lea.vmem (%p944_p3), [#allocation2], %s732_s24 }
   0xf   : > { %v177_v0 = vld [vmem:[%s160_s27] sm:$0xf] (%p944_p3)  ;;  %v179_v1 = vld [vmem:[%s160_s27 + $0x8] sm:$0xf] (%p944_p3) }
  0x10   : > { %178 = vst [vmem:[%s156_s28] sm:$0xf] (%p944_p3), %v177_v0  ;;  %180 = vst [vmem:[%s156_s28 + $0x4] sm:$0xf] (%p944_p3), %v179_v1 }
  0x11 PF: > { %208 = sbr.rel (!%p944_p3) target bundleno = 22 (0x16), region = 65  ;;  %s210_s29 = sand.u32 (%p944_p3), 1, %s873_s13  }
  0x12   : > { %s758_s30 = sshll.u32 (%p944_p3), %s881_s15, 4  ;;  %s735_s4 = sshll.u32 (%p944_p3), %s210_s29, 3 }
  0x13   : > { %s664_s7 = scalar_lea.vmem (%p944_p3), %s1018_s1, %s758_s30  ;;  %s212_s8 = scalar_lea.vmem (%p944_p3), [#allocation3], %s735_s4 }
  0x14   : > { %v738_v2 = vld [vmem:[%s664_s7 + $0x4] sm:$0xf] (%p944_p3)  ;;  %v739_v3 = vld [vmem:[%s664_s7 + $0xc] sm:$0xf] (%p944_p3) }
  0x15   : > { %235 = vst [vmem:[%s212_s8] sm:$0xf] (%p944_p3), %v738_v2  ;;  %237 = vst [vmem:[%s212_s8 + $0x4] sm:$0xf] (%p944_p3), %v739_v3 }
  0x16 PF: > { %p740_p6 = scmp.ge.s32.totalorder %s885_s16, 1  ;;  %p264_p7 = scmp.lt.s32.totalorder %s885_s16, 3 }
  0x18   : > { %p265_p8 = pnand %p740_p6, %p264_p7 }
  0x19   : > { %s271_s9 = sand.u32 (!%p265_p8), 1, %s869_s12   ;;  %s889_s19 = smov (!%p265_p8), 126  }
  0x1a   : > { %268 = sbr.rel (%p265_p8) target bundleno = 511 (0x1ff), region = 106  ;;  %s741_s10 = sshll.u32 (!%p265_p8), %s271_s9, 3 }
  0x1b   : > { %s273_s11 = scalar_lea.vmem (!%p265_p8), [#allocation2], %s741_s10  ;;  %s280_s18 = scalar_lea.vmem (!%p265_p8), [#allocation3], %s741_s10 }
  0x1c   : > { %s890_s20 = smov (!%p265_p8), 127   ;;  %s891_s23 = smov (!%p265_p8), 125  }
  0x1d   : > { %s892_s24 = smov (!%p265_p8), 124   ;;  %p308_p9 = scmp.lt.s32.totalorder (!%p265_p8), %s877_s14, 1 }
  0x1f   : > { %v887_v4 = vmov 0.0   ;;  %vm888_vm0 = vmmov 0   ;;  %v845_v5 = vld [vmem:[%s273_s11] sm:$0xff]   ;;  %v846_v6 = vld [vmem:[%s280_s18] sm:$0xff]   ;;  %vm342_vm1 = vcmask 130048   ;;  %vm335_vm2 = vcmask 1039360  }
  0x20   : > { %769 = vmatprep.subr.bf16.mxu0 %v887_v4  ;;  %775 = vmatprep.subr.bf16.mxu1 %v887_v4  ;;  %v320_v7 = vld [vmem:[%s1019_s2] sm:$0xf]  ;;  %vm434_vm3 = vcmask 1031168   ;;  %v746_v13 = vld [vmem:[%s1019_s2 + $0x4] sm:$0xf]  ;;  %vm489_vm4 = vcmask 1022976   ;;  %v612_v36 = vlaneseq }
  0x21   : > { %771 = vmatprep.mubr.msk.bf16.mxu0 %vm888_vm0, %v887_v4  ;;  %777 = vmatprep.mubr.msk.bf16.mxu1 %vm888_vm0, %v887_v4  ;;  %v751_v18 = vld [vmem:[%s1019_s2 + $0xc] sm:$0xf]  ;;  %vm544_vm5 = vcmask 1014784   ;;  %v749_v21 = vld [vmem:[%s1019_s2 + $0x8] sm:$0xf]  ;;  %s1029_s14 = smov (!%p308_p9, %s877_s14), 1 }
  0x22   : > { %430 = vrot.lane.b32.xlu1 %v845_v5, %s889_s19  ;;  %326 = vrot.lane.b32.xlu0 %v845_v5, %s890_s20  ;;  %v753_v23 = vld [vmem:[%s1019_s2 + $0x10] sm:$0xf]  ;;  %v613_v42 = vand.u32 127, %v612_v36  ;;  %s743_s6 = sshll.u32 %s1029_s14, 3  ;;  %vm624_vm7 = vcmask 7168   ;;  %vm626_vm8 = vcmask 15360  }
  0x23   : > { %776 = vmatpush3.bf16.msra.mxu1 %v845_v5  ;;  %s314_s9 = scalar_lea.vmem %s1020_s3, %s743_s6 }
  0x24   : > { %787 = vmatprep.subr.bf16.mxu1 %v887_v4  ;;  %vm617_vm6 = vcmp.lt.s32.totalorder %v613_v42, 16 }
  0x26   : > { %432 = vrot.lane.b32.xlu1 %v846_v6, %s889_s19  ;;  %333 = vrot.lane.b32.xlu0 %v846_v6, %s890_s20 }
  0x27   : > { %778 = vmatmul.mubr.msk.bf16.vlgmr.msra.gmra.mxu1 %vm342_vm1, %v320_v7 }
  0x28   : > { %789 = vmatprep.mubr.msk.bf16.mxu1 %vm888_vm0, %v887_v4 }
  0x2a   : > { %487 = vrot.lane.b32.xlu1 %v846_v6, %s891_s23  ;;  %485 = vrot.lane.b32.xlu0 %v845_v5, %s891_s23 }
  0x2e   : > { %542 = vrot.lane.b32.xlu1 %v846_v6, %s892_s24  ;;  %540 = vrot.lane.b32.xlu0 %v845_v5, %s892_s24 }
  0x94   : > { %v431_v8 = vpop.permute.xlu1 %430  ;;  %v327_v9 = vpop.permute.xlu0 %326 }
  0x98   : > { %v433_v10 = vpop.permute.xlu1 %432  ;;  %v334_v11 = vpop.permute.xlu0 %333 }
  0x99   : > { %v338_v12 = vsel %vm335_vm2, %v327_v9, %v334_v11  ;;  %v437_v14 = vsel %vm434_vm3, %v431_v8, %v433_v10 }
  0x9a   : > { %770 = vmatpush3.bf16.msra.mxu0 %v338_v12 }
  0x9b   : > { %781 = vmatprep.subr.bf16.mxu0 %v887_v4 }
  0x9c   : > { %v488_v15 = vpop.permute.xlu1 %487  ;;  %v486_v16 = vpop.permute.xlu0 %485 }
  0x9d   : > { %772 = vmatmul.mubr.msk.bf16.vlgmr.msra.gmra.mxu0 %vm342_vm1, %v746_v13  ;;  %v492_v17 = vsel %vm489_vm4, %v486_v16, %v488_v15 }
  0x9e   : > { %782 = vmatpush3.bf16.msra.mxu0 %v437_v14  ;;  %788 = vmatpush3.bf16.msra.mxu1 %v492_v17 }
  0x9f   : > { %783 = vmatprep.mubr.msk.bf16.mxu0 %vm888_vm0, %v887_v4  ;;  %793 = vmatprep.subr.bf16.mxu0 %v887_v4 }
  0xa0   : > { %v543_v19 = vpop.permute.xlu1 %542  ;;  %v541_v20 = vpop.permute.xlu0 %540 }
  0xa1   : > { %790 = vmatmul.mubr.msk.bf16.vlgmr.msra.gmra.mxu1 %vm342_vm1, %v751_v18  ;;  %v547_v22 = vsel %vm544_vm5, %v541_v20, %v543_v19 }
  0xa5   : > { %784 = vmatmul.mubr.msk.bf16.vlgmr.msra.gmra.mxu0 %vm342_vm1, %v749_v21 }
  0xa6   : > { %794 = vmatpush3.bf16.msra.mxu0 %v547_v22  ;;  %795 = vmatprep.mubr.msk.bf16.mxu0 %vm888_vm0, %v887_v4 }
  0xad   : > { %796 = vmatmul.mubr.msk.bf16.vlgmr.msra.gmra.mxu0 %vm342_vm1, %v753_v23 }
  0xe7   : > { %v424_v24 = vpop.f32.mrf.mxu1 }
  0xe9   : > { %v779_v25 = vpop.f32.mrf.mxu1 }
  0xeb   : > { %v427_v26 = vpop.f32.mrf.mxu1 }
  0xed   : > { %v780_v27 = vpop.f32.mrf.mxu1 }
 0x15d   : > { %v380_v28 = vpop.f32.mrf.mxu0 }
 0x15e   : > { %v425_v37 = vadd.f32 %v424_v24, %v380_v28 }
 0x15f   : > { %v773_v29 = vpop.f32.mrf.mxu0 }
 0x161   : > { %v383_v30 = vpop.f32.mrf.mxu0  ;;  %v533_v31 = vpop.f32.mrf.mxu1 }
 0x163   : > { %v774_v32 = vpop.f32.mrf.mxu0  ;;  %v791_v33 = vpop.f32.mrf.mxu1 }
 0x165   : > { %v478_v34 = vpop.f32.mrf.mxu0  ;;  %v536_v35 = vpop.f32.mrf.mxu1 }
 0x166   : > { %v484_v40 = vadd.f32 %v478_v34, %v425_v37 }
 0x167   : > { %v785_v38 = vpop.f32.mrf.mxu0  ;;  %v792_v39 = vpop.f32.mrf.mxu1 }
 0x168   : > { %v539_v44 = vadd.f32 %v533_v31, %v484_v40 }
 0x169   : > { %v481_v41 = vpop.f32.mrf.mxu0 }
 0x16b   : > { %v786_v43 = vpop.f32.mrf.mxu0 }
 0x16d   : > { %v588_v45 = vpop.f32.mrf.mxu0 }
 0x16e   : > { %v594_v46 = vadd.f32 %v588_v45, %v539_v44 }
 0x16f   : > { %v797_v47 = vpop.f32.mrf.mxu0 }
 0x170   : > { %v618_v48 = vsel %vm617_vm6, %v594_v46, 0.0 }
 0x171   : > { %v591_v49 = vpop.f32.mrf.mxu0  ;;  %619 = vadd.xlane.f32.xlu0 %v618_v48  ;;  %v621_v50 = vmul.f32 %v618_v48, %v618_v48 }
 0x173   : > { %v798_v51 = vpop.f32.mrf.mxu0  ;;  %622 = vadd.xlane.f32.xlu1 %v621_v50 }
 0x1fa   : > { %v620_v52 = vpop.xlane.xlu0 %619 }
 0x1fc   : > { %v623_v53 = vpop.xlane.xlu1 %622 }
 0x1fd   : > { %v625_v54 = vsel %vm624_vm7, %v620_v52, %v623_v53 }
 0x1fe   : > { %627 = vst.msk [vmem:[%s314_s9] sm:$0xff] %vm626_vm8, %v625_v54 }
 0x1ff PF: > { %s13_s16 = sadd.s32 1, %s885_s16   ;;  %s1022_s12 = smov %s873_s13 }
 0x200   : > { %p10_p10 = scmp.ge.s32.totalorder %s13_s16, 4   ;;  %s1023_s13 = smov %s952_s21 }
 0x201   : > { %s1024_s14 = smov %s881_s15  ;;  %s1025_s15 = smov %s1027_s17 }
 0x202   :  { %12 = sbr.rel (!%p10_p10) target bundleno = 3 (0x3), region = 169 }

// kernel: conv_module_forward.3
= control target key start
LH: loop header
LB: loop body
LE: loop exit
PB: predicated region body
PF: predicated region fallthrough
CT: control target
= control target key end

     0   :  { %10 = vsyncpa [#allocation5], 0  ;;  %s1204_s0 = inlined_call_operand.vmem [shape: bf16[2,16,256], index: 0, kind: input, shape index: {}, may-alias: {0,1}]   ;;  %s1205_s1 = inlined_call_operand.vmem [shape: bf16[2,16,256], index: 1, kind: input, shape index: {}, may-alias: {0,1}]   ;;  %s1206_s2 = inlined_call_operand.vmem [shape: bf16[5,8,16], index: 2, kind: input, shape index: {}]   ;;  %s1207_s3 = inlined_call_operand.vmem [shape: f32[8,1], index: 3, kind: input, shape index: {}]   ;;  %s1208_s4 = inlined_call_operand.vmem [shape: f32[8,1], index: 4, kind: input, shape index: {}]   ;;  %s1209_s5 = inlined_call_operand.hbm [shape: f32[2,8,128], index: 5, kind: output, shape index: {}]  }
   0x1   :  { %12 = vsyncpa [#allocation5 + $0x1], 0  ;;  %s1037_s18 = smov 0   ;;  %s1039_s19 = smov 0  }
   0x2   :  { %s1041_s20 = smov 0   ;;  %s1043_s21 = smov 0  }
   0x3   :  { %s1045_s22 = smov 0   ;;  %s1047_s23 = smov 0  }
   0x4 LB: > { %s777_s24 = sadd.s32 4294967295, %s997_s23   ;;  %s778_s25 = sadd.s32 4294967294, %s997_s23   ;;  %s997_s23 = sphi %s1047_s23, %s18_s23   ;;  %s993_s22 = sphi %s1045_s22, %s1219_s22   ;;  %s989_s21 = sphi %s1043_s21, %s1218_s21   ;;  %s985_s20 = sphi %s1041_s20, %s1217_s20   ;;  %s981_s19 = sphi %s1039_s19, %s1216_s19   ;;  %s977_s18 = sphi %s1037_s18, %s1215_s18  }
   0x5   : > { %s30_s26 = sadd.s32 1, %s993_s22  ;;  %s39_s27 = sadd.s32 1, %s985_s20 }
   0x6   : > { %p32_p0 = scmp.ge.s32.totalorder %s30_s26, 2  ;;  %p46_p1 = scmp.ne.s32.totalorder %s985_s20, %s981_s19 }
   0x7   : > { %p47_p2 = scmp.eq.s32.totalorder %s997_s23, 0  ;;  %p171_p3 = scmp.eq.s32.totalorder %s777_s24, 1 }
   0x8   : > { %s1221_s26 = smov (%p32_p0, %s30_s26), 0  ;;  %p176_p6 = scmp.ne.s32.totalorder %s981_s19, %s977_s18 }
   0x9   : > { %p1076_p4 = por %p47_p2, %p46_p1  ;;  %p1080_p5 = por %p171_p3, %p46_p1 }
   0xa   : > { %s34_s30 = ssub.s32 %s993_s22, %s1221_s26  ;;  %p177_p8 = scmp.eq.s32.totalorder %s778_s25, 1 }
   0xb   : > { %p37_p7 = scmp.eq.s32.totalorder %s34_s30, 0  ;;  %p1210_p10 = scmp.ge.s32.totalorder %s997_s23, 2 }
   0xc   : > { %p1091_p9 = por %p177_p8, %p176_p6 }
   0xd   : > { %s1089_s6 = scalar_select %p37_p7, %s985_s20, %s39_s27  }
   0xe   : > { %202 = sbr.rel (%p1210_p10) target bundleno = 29 (0x1d), region = 28 }
  0x13   : > { %205 = sbr.rel (!%p1076_p4) target bundleno = 24 (0x18), region = 32  ;;  %s207_s8 = sand.u32 (%p1076_p4), 1, %s985_s20  }
  0x14   : > { %s809_s9 = sshll.u32 (%p1076_p4), %s993_s22, 4  ;;  %s781_s10 = sshll.u32 (%p1076_p4), %s207_s8, 3 }
  0x15   : > { %s213_s13 = scalar_lea.vmem (%p1076_p4), %s1204_s0, %s809_s9  ;;  %s209_s14 = scalar_lea.vmem (%p1076_p4), [#allocation2], %s781_s10 }
  0x16   : > { %v230_v0 = vld [vmem:[%s213_s13] sm:$0xf] (%p1076_p4)  ;;  %v232_v1 = vld [vmem:[%s213_s13 + $0x8] sm:$0xf] (%p1076_p4) }
  0x17   : > { %231 = vst [vmem:[%s209_s14] sm:$0xf] (%p1076_p4), %v230_v0  ;;  %233 = vst [vmem:[%s209_s14 + $0x4] sm:$0xf] (%p1076_p4), %v232_v1 }
  0x18 PF: > { %261 = sbr.rel (!%p1076_p4) target bundleno = 29 (0x1d), region = 73  ;;  %s263_s15 = sand.u32 (%p1076_p4), 1, %s985_s20  }
  0x19   : > { %s810_s16 = sshll.u32 (%p1076_p4), %s993_s22, 4  ;;  %s784_s17 = sshll.u32 (%p1076_p4), %s263_s15, 3 }
  0x1a   : > { %s712_s27 = scalar_lea.vmem (%p1076_p4), %s1205_s1, %s810_s16  ;;  %s265_s30 = scalar_lea.vmem (%p1076_p4), [#allocation3], %s784_s17 }
  0x1b   : > { %v787_v2 = vld [vmem:[%s712_s27 + $0x4] sm:$0xf] (%p1076_p4)  ;;  %v788_v3 = vld [vmem:[%s712_s27 + $0xc] sm:$0xf] (%p1076_p4) }
  0x1c   : > { %288 = vst [vmem:[%s265_s30] sm:$0xf] (%p1076_p4), %v787_v2  ;;  %290 = vst [vmem:[%s265_s30 + $0x4] sm:$0xf] (%p1076_p4), %v788_v3 }
  0x1d PF: > { %p789_p11 = scmp.ge.s32.totalorder %s997_s23, 1  ;;  %p317_p12 = scmp.lt.s32.totalorder %s997_s23, 3 }
  0x1f   : > { %p318_p13 = pnand %p789_p11, %p317_p12 }
  0x20   : > { %s324_s28 = sand.u32 (!%p318_p13), 1, %s981_s19   ;;  %s1001_s11 = smov (!%p318_p13), 126  }
  0x21   : > { %321 = sbr.rel (%p318_p13) target bundleno = 426 (0x1aa), region = 114  ;;  %s1117_s8 = sshll.u32 (!%p318_p13), %s324_s28, 3 }
  0x22   : > { %s326_s9 = scalar_lea.vmem (!%p318_p13), [#allocation2], %s1117_s8  ;;  %s333_s10 = scalar_lea.vmem (!%p318_p13), [#allocation3], %s1117_s8 }
  0x23   : > { %s1002_s12 = smov (!%p318_p13), 127   ;;  %s1003_s15 = smov (!%p318_p13), 125  }
  0x24   : > { %s1004_s16 = smov (!%p318_p13), 124   ;;  %s361_s17 = scalar_lea.vmem (!%p318_p13), [#allocation4], %s1117_s8 }
  0x25   : > { %s680_s24 = sshll.u32 (!%p318_p13), %s361_s17, 4  ;;  %s681_s24 = int_to_ptr.vmem [resolvable:$true] %s680_s24 }
  0x26   : > { %v999_v4 = vmov 0.0   ;;  %vm1000_vm0 = vmmov 0   ;;  %v915_v5 = vld [vmem:[%s326_s9] sm:$0xff]   ;;  %v916_v6 = vld [vmem:[%s333_s10] sm:$0xff]   ;;  %vm390_vm1 = vcmask 130048   ;;  %v1005_v8 = vmov 0  }
  0x27   : > { %821 = vmatprep.subr.bf16.mxu0 %v999_v4  ;;  %827 = vmatprep.subr.bf16.mxu1 %v999_v4  ;;  %v368_v7 = vld [vmem:[%s1206_s2] sm:$0xf]  ;;  %vm383_vm2 = vcmask 1039360   ;;  %vm482_vm3 = vcmask 1031168   ;;  %v795_v16 = vld [vmem:[%s1206_s2 + $0x4] sm:$0xf] }
  0x28   : > { %823 = vmatprep.mubr.msk.bf16.mxu0 %vm1000_vm0, %v999_v4  ;;  %829 = vmatprep.mubr.msk.bf16.mxu1 %vm1000_vm0, %v999_v4  ;;  %v643_v9 = vld [vmem:[%s1207_s3] sm:$0xff]  ;;  %vm537_vm4 = vcmask 1022976   ;;  %v800_v21 = vld [vmem:[%s1206_s2 + $0xc] sm:$0xf]  ;;  %vm592_vm5 = vcmask 1014784   ;;  %s666_s9 = scalar_lea.sflag [#allocation5], %s324_s28 }
  0x29   : > { %478 = vrot.lane.b32.xlu1 %v915_v5, %s1001_s11  ;;  %374 = vrot.lane.b32.xlu0 %v915_v5, %s1002_s12  ;;  %v650_v10 = vld [vmem:[%s1208_s4] sm:$0xff]  ;;  %v798_v24 = vld [vmem:[%s1206_s2 + $0x8] sm:$0xf]  ;;  %s921_s10 = scalar_lea.vmem %s681_s24, 128 }
  0x2a   : > { %828 = vmatpush3.bf16.msra.mxu1 %v915_v5  ;;  %913 = vset.pattern.permute.xlu0 %v1005_v8  ;;  %v802_v26 = vld [vmem:[%s1206_s2 + $0x10] sm:$0xf]  ;;  %p922_p0 = scmp.ne.s32.totalorder %s681_s24, %s921_s10 }
  0x2b   : > { %839 = vmatprep.subr.bf16.mxu1 %v999_v4  ;;  %914 = vset.pattern.permute.xlu1 %v1005_v8 }
  0x2c   : > { %p923_p1 = pnand %p922_p0, %p1080_p5 }
  0x2d   : > { %480 = vrot.lane.b32.xlu1 %v916_v6, %s1001_s11  ;;  %381 = vrot.lane.b32.xlu0 %v916_v6, %s1002_s12  ;;  %s1006_s11 = smov [#allocation4]  }
  0x2e   : > { %830 = vmatmul.mubr.msk.bf16.vlgmr.msra.gmra.mxu1 %vm390_vm1, %v368_v7  ;;  %p924_p2 = pneg %p923_p1  ;;  %s925_s12 = sshll.u32 %s1006_s11, 4  ;;  %s926_s12 = int_to_ptr.vmem [resolvable:$false] %s925_s12 }
  0x2f   : > { %841 = vmatprep.mubr.msk.bf16.mxu1 %vm1000_vm0, %v999_v4  ;;  %p928_p3 = scmp.lt.s32.totalorder %s681_s24, %s926_s12 }
  0x31   : > { %535 = vrot.lane.b32.xlu1 %v916_v6, %s1003_s15  ;;  %533 = vrot.lane.b32.xlu0 %v915_v5, %s1003_s15 }
  0x35   : > { %590 = vrot.lane.b32.xlu1 %v916_v6, %s1004_s16  ;;  %588 = vrot.lane.b32.xlu0 %v915_v5, %s1004_s16  ;;  %s806_s16 = sshll.u32 %s989_s21, 7  ;;  %s927_s21 = scalar_lea.vmem %s926_s12, 256 }
  0x36   : > { %s678_s30 = scalar_lea.hbm %s1209_s5, %s806_s16  ;;  %p929_p4 = scmp.lt.s32.totalorder %s927_s21, %s921_s10 }
  0x38   : > { %p930_p6 = por %p929_p4, %p928_p3 }
  0x39   : > { %646 = vperm.xlu0 %913, %v643_v9   ;;  %653 = vperm.xlu1 %914, %v650_v10  }
  0x3a   : > { %p931_p7 = pnand %p930_p6, %p924_p2 }
  0x9b   : > { %v479_v11 = vpop.permute.xlu1 %478  ;;  %v375_v12 = vpop.permute.xlu0 %374 }
  0x9f   : > { %v481_v13 = vpop.permute.xlu1 %480  ;;  %v382_v14 = vpop.permute.xlu0 %381 }
  0xa0   : > { %v386_v15 = vsel %vm383_vm2, %v375_v12, %v382_v14  ;;  %v485_v17 = vsel %vm482_vm3, %v479_v11, %v481_v13 }
  0xa1   : > { %822 = vmatpush3.bf16.msra.mxu0 %v386_v15 }
  0xa2   : > { %833 = vmatprep.subr.bf16.mxu0 %v999_v4 }
  0xa3   : > { %v536_v18 = vpop.permute.xlu1 %535  ;;  %v534_v19 = vpop.permute.xlu0 %533 }
  0xa4   : > { %824 = vmatmul.mubr.msk.bf16.vlgmr.msra.gmra.mxu0 %vm390_vm1, %v795_v16  ;;  %v540_v20 = vsel %vm537_vm4, %v534_v19, %v536_v18 }
  0xa5   : > { %834 = vmatpush3.bf16.msra.mxu0 %v485_v17  ;;  %840 = vmatpush3.bf16.msra.mxu1 %v540_v20 }
  0xa6   : > { %835 = vmatprep.mubr.msk.bf16.mxu0 %vm1000_vm0, %v999_v4  ;;  %845 = vmatprep.subr.bf16.mxu0 %v999_v4 }
  0xa7   : > { %v591_v22 = vpop.permute.xlu1 %590  ;;  %v589_v23 = vpop.permute.xlu0 %588 }
  0xa8   : > { %842 = vmatmul.mubr.msk.bf16.vlgmr.msra.gmra.mxu1 %vm390_vm1, %v800_v21  ;;  %v595_v25 = vsel %vm592_vm5, %v589_v23, %v591_v22 }
  0xac   : > { %836 = vmatmul.mubr.msk.bf16.vlgmr.msra.gmra.mxu0 %vm390_vm1, %v798_v24 }
  0xad   : > { %846 = vmatpush3.bf16.msra.mxu0 %v595_v25  ;;  %847 = vmatprep.mubr.msk.bf16.mxu0 %vm1000_vm0, %v999_v4 }
  0xb4   : > { %848 = vmatmul.mubr.msk.bf16.vlgmr.msra.gmra.mxu0 %vm390_vm1, %v802_v26  ;;  %v647_v47 = vpop.permute.xlu0 %646  ;;  %v654_v50 = vpop.permute.xlu1 %653 }
  0xee   : > { %v472_v27 = vpop.f32.mrf.mxu1 }
  0xf0   : > { %v831_v28 = vpop.f32.mrf.mxu1 }
  0xf2   : > { %v475_v29 = vpop.f32.mrf.mxu1 }
  0xf4   : > { %v832_v30 = vpop.f32.mrf.mxu1 }
 0x164   : > { %v428_v31 = vpop.f32.mrf.mxu0 }
 0x165   : > { %v473_v39 = vadd.f32 %v472_v27, %v428_v31 }
 0x166   : > { %v825_v32 = vpop.f32.mrf.mxu0 }
 0x168   : > { %v431_v33 = vpop.f32.mrf.mxu0  ;;  %v581_v34 = vpop.f32.mrf.mxu1 }
 0x16a   : > { %v826_v35 = vpop.f32.mrf.mxu0  ;;  %v843_v36 = vpop.f32.mrf.mxu1 }
 0x16c   : > { %v526_v37 = vpop.f32.mrf.mxu0  ;;  %v584_v38 = vpop.f32.mrf.mxu1 }
 0x16d   : > { %v532_v42 = vadd.f32 %v526_v37, %v473_v39 }
 0x16e   : > { %v837_v40 = vpop.f32.mrf.mxu0  ;;  %v844_v41 = vpop.f32.mrf.mxu1 }
 0x16f   : > { %v587_v45 = vadd.f32 %v581_v34, %v532_v42 }
 0x170   : > { %v529_v43 = vpop.f32.mrf.mxu0 }
 0x172   : > { %v838_v44 = vpop.f32.mrf.mxu0 }
 0x174   : > { %v636_v46 = vpop.f32.mrf.mxu0 }
 0x175   : > { %v642_v48 = vadd.f32 %v636_v46, %v587_v45 }
 0x176   : > { %v849_v49 = vpop.f32.mrf.mxu0 }
 0x177   : > { %v649_v51 = vmul.f32 %v647_v47, %v642_v48 }
 0x178   : > { %v639_v52 = vpop.f32.mrf.mxu0 }
 0x179   : > { %v656_v53 = vadd.f32 %v654_v50, %v649_v51 }
 0x17a   : > { %v850_v54 = vpop.f32.mrf.mxu0 }
 0x17b   : > { %v804_v55 = vmul.f32 -1.442695, %v656_v53 }
 0x17d   : > { %917 = vpow2.f32 %v804_v55 }
 0x18a   : > { %v918_v56 = vpop.eup %917 }
 0x18b   : > { %v660_v57 = vadd.f32 1.0, %v918_v56 }
 0x18d   : > { %919 = vrcp.f32 %v660_v57 }
 0x19a   : > { %v920_v58 = vpop.eup %919 }
 0x19b   : > { %v663_v59 = vmul.f32 %v920_v58, %v656_v53 }
 0x19d   : > { %664 = vst [vmem:[%s361_s17] sm:$0xff] %v663_v59 }
 0x19e   : > { %934 = shalt.err (!%p931_p7)
}
 0x19f   : > { %s935_s8 = scalar_lea.hbm %s678_s30, 128  ;;  %s939_s14 = scalar_lea.hbm %s1209_s5, 256 }
 0x1a0   : > { %p936_p8 = scmp.ne.s32.totalorder %s678_s30, %s935_s8  ;;  %p940_p13 = scmp.lt.s32.totalorder %s678_s30, %s1209_s5 }
 0x1a1   : > { %p941_p0 = scmp.lt.s32.totalorder %s939_s14, %s935_s8 }
 0x1a2   : > { %p937_p11 = pnand %p936_p8, %p1080_p5 }
 0x1a3   : > { %p942_p1 = por %p941_p0, %p940_p13 }
 0x1a4   : > { %p938_p12 = pneg %p937_p11 }
 0x1a6   : > { %p943_p10 = pnand %p942_p1, %p938_p12 }
 0x1a8   : > { %946 = shalt.err (!%p943_p10)
}
 0x1a9   : > { %851 = dma.vmem_to_hbm [thread:$0]  (%p1080_p5), %s681_s24, 128, %s678_s30, %s666_s9  }
 0x1aa PF: > { %s692_s17 = sand.u32 1, %s977_s18   ;;  %p1214_p2 = scmp.ge.s32.totalorder %s997_s23, 2 }
 0x1ab   : > { %s693_s25 = scalar_lea.sflag [#allocation5], %s692_s17 }
 0x1ac   : > { %p854_p3 = pnand %p1214_p2, %p1091_p9 }
 0x1ae   : > { %p855_p4 = pneg %p854_p3 }
 0x1b0   : > { %972 = dma.done.wait (%p855_p4), %s693_s25, 128  }
 0x1b1   : > { %974 = vsyncadd (%p855_p4), %s693_s25, 4294967168  ;;  %s18_s23 = sadd.s32 1, %s997_s23   ;;  %s1215_s18 = smov %s981_s19 }
 0x1b2   : > { %p15_p6 = scmp.ge.s32.totalorder %s18_s23, 4   ;;  %s1216_s19 = smov %s985_s20 }
 0x1b3   : > { %s1217_s20 = smov %s1089_s6  ;;  %s1218_s21 = smov %s993_s22 }
 0x1b4   : > { %s1219_s22 = smov %s1221_s26  ;;  %17 = sbr.rel (!%p15_p6) target bundleno = 4 (0x4), region = 174 }
 0x1b9   :  { %698 = vsyncpa [#allocation5], 1 }
 0x1ba   :  { %700 = vsyncpa [#allocation5 + $0x1], 1 }

</bundles_post_ra>
